<compile_context>
chip_gen: v7x
topology: tpu7x:2x2x1
jax: 0.10.0
libtpu: 0.0.40
codegen_flags: <defaults>
</compile_context>

<pallas_src>
import jax
import jax.numpy as jnp
from jax.experimental import pallas as pl
from jax.experimental.pallas import tpu as pltpu

# --- constants from hardpwl.__init__ (pwl_type = "hswish") -------------------
COEFF = (-0.0, -0.359375, -0.0625, 0.28125, 0.625, 0.953125, 1.296875, 1.0)
BIAS = (0.0, -1.09375, -0.453125, -0.03125, 0.015625, -0.28125, -0.921875, -0.0)
SPLIT = (-3.0, -2.1787109375, -1.228515625, -0.130859375, 0.89453125,
         1.83740234375, 2.98828125)
SCALE = 0.25

# Folded constants (bit-exact fold: SCALE is a power of two and all
# coefficients/biases are short dyadic rationals):
#   segment i value        = BIAS[i] + (COEFF[i] * SCALE) * x
#   breakpoint i (x space) = SPLIT[i] / SCALE
_SLOPE = tuple(c * SCALE for c in COEFF)      # 8 slopes (bf16-exact too)
_THRESH = tuple(s / SCALE for s in SPLIT)     # 7 breakpoints (NOT all bf16-exact)

_LANE = 128
_W_CANDIDATES = (2048, 1024, 512, 256, 128)


def _hardpwl_kernel(x_ref, o_ref):
    x = x_ref[...]
    # Breakpoint compares always in f32: several folded thresholds (e.g.
    # -8.71484375) are not bf16-exact, so classification stays exact for any
    # input dtype.  (No-op cast for f32 inputs.)
    xc = x.astype(jnp.float32)

    # Slope/bias selection + final affine run in the native dtype for bf16
    # inputs (bf16 VALU on v6e/v7x packs 16x128 per vreg); every folded slope
    # and bias is exactly representable in bf16.  Everything else -> f32.
    cdt = jnp.bfloat16 if x_ref.dtype == jnp.bfloat16 else jnp.float32
    xa = x.astype(cdt)

    # Restructured monotone ladder: select SLOPE and BIAS per element, then a
    # single affine.  7 cmp + 14 select + 1 mul + 1 add = 23 VALU ops/element.
    # NaN inputs fail every `x < thr` test -> top segment (slope 0.25*1.0) ->
    # NaN output, matching the original.
    slope = jnp.full(x.shape, _SLOPE[-1], cdt)
    bias = jnp.full(x.shape, BIAS[-1], cdt)
    for i in range(len(_THRESH) - 1, -1, -1):
        m = xc < _THRESH[i]
        slope = jnp.where(m, jnp.asarray(_SLOPE[i], cdt), slope)
        bias = jnp.where(m, jnp.asarray(BIAS[i], cdt), bias)

    # TODO(synk): the PyTorch `(pwl*scale - hswish).detach() + hswish` trick is
    # a training-graph (straight-through) construct; its forward value equals
    # pwl*scale to within ~1 ulp, so the dead hardswish branch is omitted.
    o_ref[...] = (xa * slope + bias).astype(o_ref.dtype)


def _hardpwl_jnp(x):
    """Pure-jnp evaluation of the same folded PWL (used only for tiny tails)."""
    xc = x.astype(jnp.float32)
    out = xc * _SLOPE[-1] + BIAS[-1]
    for i in range(len(_THRESH) - 1, -1, -1):
        out = jnp.where(xc < _THRESH[i], xc * _SLOPE[i] + BIAS[i], out)
    return out.astype(x.dtype)


def _round_up(a: int, b: int) -> int:
    return ((a + b - 1) // b) * b


def _pick_width(n: int, sublane: int):
    """Widest lane-dense W that divides n exactly (prefers >= one sublane tile)."""
    for w in _W_CANDIDATES:
        if n % w == 0 and n // w >= sublane:
            return w
    for w in _W_CANDIDATES:
        if n % w == 0:
            return w
    return None


def _run_kernel(x2d: jax.Array, sublane: int) -> jax.Array:
    rows, W = x2d.shape
    itemsize = jnp.dtype(x2d.dtype).itemsize

    # ~4 MiB per block buffer -> in+out double-buffered ~= 16 MiB pipeline
    # VMEM.  vmem_limit_bytes=32 MiB gives headroom over v5e's 16 MiB default
    # scoped limit and stays well inside v7x's 64 MiB physical VMEM.
    target_bytes = 4 * 1024 * 1024
    target_rows = max(sublane,
                      (target_bytes // (W * itemsize)) // sublane * sublane)

    if rows <= target_rows:
        block_rows = rows          # single full-extent block (no alignment needed)
        grid_n = 1
    else:
        block_rows = target_rows   # sublane-aligned; last block clipped by Pallas
        grid_n = pl.cdiv(rows, block_rows)

    # v7x has 2 TensorCores sharing the 'parallel' grid axis: make sure there
    # are at least two blocks whenever there is enough data to split.
    if grid_n == 1 and rows >= 2 * sublane:
        block_rows = _round_up(pl.cdiv(rows, 2), sublane)
        grid_n = pl.cdiv(rows, block_rows)

    return pl.pallas_call(
        _hardpwl_kernel,
        out_shape=jax.ShapeDtypeStruct((rows, W), x2d.dtype),
        grid=(grid_n,),
        in_specs=[pl.BlockSpec((block_rows, W), lambda i: (i, 0))],
        out_specs=pl.BlockSpec((block_rows, W), lambda i: (i, 0)),
        compiler_params=pltpu.CompilerParams(
            dimension_semantics=("parallel",),
            vmem_limit_bytes=32 * 1024 * 1024),
        cost_estimate=pl.CostEstimate(
            flops=23 * rows * W,
            transcendentals=0,
            bytes_accessed=2 * rows * W * itemsize),
    )(x2d)


@jax.jit
def hardpwl_hswish(x: jax.Array) -> jax.Array:
    """Elementwise hardpwl('hswish') forward pass."""
    orig_shape = x.shape
    n = x.size
    if n == 0:
        return x
    itemsize = jnp.dtype(x.dtype).itemsize
    # sublane granule: 8 rows for 4-byte, 16 for 2-byte, 32 for 1-byte dtypes
    sublane = max(8, 32 // max(itemsize, 1))

    xf = x.reshape(-1)
    W = _pick_width(n, sublane)

    if W is None:
        # n % 128 != 0 (rare): kernel handles the lane-aligned bulk prefix and
        # a tiny (<128-element) pure-jnp tail is appended — avoids the full
        # read+write passes of a whole-tensor pad and trailing slice.
        W = _LANE
        bulk = (n // W) * W
        if bulk == 0:
            return _hardpwl_jnp(xf).reshape(orig_shape)
        body = _run_kernel(xf[:bulk].reshape(bulk // W, W), sublane)
        tail = _hardpwl_jnp(xf[bulk:])
        return jnp.concatenate([body.reshape(-1), tail]).reshape(orig_shape)

    rows = n // W
    out = _run_kernel(xf.reshape(rows, W), sublane)
    return out.reshape(orig_shape)


def _hardpwl_ref(x: jax.Array) -> jax.Array:
    """Pure-JAX reference mirroring the PyTorch forward exactly."""
    seg = jnp.asarray(SPLIT, jnp.float32) / SCALE
    intc = jnp.asarray(BIAS, jnp.float32) / SCALE
    coeff = jnp.asarray(COEFF, jnp.float32)
    pwl = jnp.zeros_like(x)
    pwl = jnp.where(x < seg[0], intc[0] + coeff[0] * x, pwl)
    for i in range(len(SPLIT)):
        mask = (x >= seg[i - 1]) & (x < seg[i])
        pwl = jnp.where(mask, intc[i] + coeff[i] * x, pwl)
    pwl = jnp.where(x >= seg[-1], intc[-1] + coeff[-1] * x, pwl)
    y = x * SCALE
    hsw = y * jnp.clip(y + 3.0, 0.0, 6.0) / 6.0
    return (pwl * SCALE - hsw) + hsw


if __name__ == "__main__":
    key = jax.random.PRNGKey(0)
    # NCHW input, spread over the full PWL breakpoint range
    x = jax.random.uniform(key, (2, 4, 16, 16), dtype=jnp.float32,
                           minval=-16.0, maxval=16.0)

    out = jax.block_until_ready(hardpwl_hswish(x))

    ref = _hardpwl_ref(x)
    assert out.shape == x.shape and out.dtype == x.dtype
    # <=1-2 ulp difference vs the reference's (a-b)+b straight-through form
    assert jnp.allclose(out, ref, atol=2e-6, rtol=1e-6), \
        float(jnp.max(jnp.abs(out - ref)))

    print("KERNEL_OK")
</pallas_src>

<mosaic_0001>
module attributes {stable_mosaic.version = 11 : i64} {
  func.func @_hardpwl_kernel(%arg0: i32, %arg1: memref<8x256xf32, #tpu.memory_space<vmem>>, %arg2: memref<8x256xf32, #tpu.memory_space<vmem>>) attributes {dimension_semantics = [#tpu.dimension_semantics<parallel>], iteration_bounds = array<i64: 1>, scalar_prefetch = 0 : i64, scratch_operands = 0 : i64, tpu.core_type = #tpu.core_type<tc>, window_params = [{transform_indices = @transform_0, window_bounds = array<i64: 8, 256>}, {transform_indices = @transform_1, window_bounds = array<i64: 8, 256>}]} {
    %c0 = arith.constant 0 : index
    %c0_0 = arith.constant 0 : index
    %0 = vector.load %arg1[%c0, %c0_0] : memref<8x256xf32, #tpu.memory_space<vmem>>, vector<8x256xf32>
    %cst = arith.constant 2.500000e-01 : f32
    %1 = vector.broadcast %cst : f32 to vector<8x256xf32>
    %cst_1 = arith.constant -0.000000e+00 : f32
    %2 = vector.broadcast %cst_1 : f32 to vector<8x256xf32>
    %cst_2 = arith.constant 11.953125 : f32
    %3 = vector.broadcast %cst_2 : f32 to vector<8x256xf32>
    %4 = arith.cmpf olt, %0, %3 : vector<8x256xf32>
    %cst_3 = arith.constant 0.32421875 : f32
    %5 = vector.broadcast %cst_3 : f32 to vector<8x256xf32>
    %6 = arith.select %4, %5, %1 : vector<8x256xi1>, vector<8x256xf32>
    %cst_4 = arith.constant -9.218750e-01 : f32
    %7 = vector.broadcast %cst_4 : f32 to vector<8x256xf32>
    %8 = arith.select %4, %7, %2 : vector<8x256xi1>, vector<8x256xf32>
    %cst_5 = arith.constant 7.34960938 : f32
    %9 = vector.broadcast %cst_5 : f32 to vector<8x256xf32>
    %10 = arith.cmpf olt, %0, %9 : vector<8x256xf32>
    %cst_6 = arith.constant 0.23828125 : f32
    %11 = vector.broadcast %cst_6 : f32 to vector<8x256xf32>
    %12 = arith.select %10, %11, %6 : vector<8x256xi1>, vector<8x256xf32>
    %cst_7 = arith.constant -2.812500e-01 : f32
    %13 = vector.broadcast %cst_7 : f32 to vector<8x256xf32>
    %14 = arith.select %10, %13, %8 : vector<8x256xi1>, vector<8x256xf32>
    %cst_8 = arith.constant 3.578125 : f32
    %15 = vector.broadcast %cst_8 : f32 to vector<8x256xf32>
    %16 = arith.cmpf olt, %0, %15 : vector<8x256xf32>
    %cst_9 = arith.constant 1.562500e-01 : f32
    %17 = vector.broadcast %cst_9 : f32 to vector<8x256xf32>
    %18 = arith.select %16, %17, %12 : vector<8x256xi1>, vector<8x256xf32>
    %cst_10 = arith.constant 1.562500e-02 : f32
    %19 = vector.broadcast %cst_10 : f32 to vector<8x256xf32>
    %20 = arith.select %16, %19, %14 : vector<8x256xi1>, vector<8x256xf32>
    %cst_11 = arith.constant -0.5234375 : f32
    %21 = vector.broadcast %cst_11 : f32 to vector<8x256xf32>
    %22 = arith.cmpf olt, %0, %21 : vector<8x256xf32>
    %cst_12 = arith.constant 7.031250e-02 : f32
    %23 = vector.broadcast %cst_12 : f32 to vector<8x256xf32>
    %24 = arith.select %22, %23, %18 : vector<8x256xi1>, vector<8x256xf32>
    %cst_13 = arith.constant -3.125000e-02 : f32
    %25 = vector.broadcast %cst_13 : f32 to vector<8x256xf32>
    %26 = arith.select %22, %25, %20 : vector<8x256xi1>, vector<8x256xf32>
    %cst_14 = arith.constant -4.9140625 : f32
    %27 = vector.broadcast %cst_14 : f32 to vector<8x256xf32>
    %28 = arith.cmpf olt, %0, %27 : vector<8x256xf32>
    %cst_15 = arith.constant -1.562500e-02 : f32
    %29 = vector.broadcast %cst_15 : f32 to vector<8x256xf32>
    %30 = arith.select %28, %29, %24 : vector<8x256xi1>, vector<8x256xf32>
    %cst_16 = arith.constant -4.531250e-01 : f32
    %31 = vector.broadcast %cst_16 : f32 to vector<8x256xf32>
    %32 = arith.select %28, %31, %26 : vector<8x256xi1>, vector<8x256xf32>
    %cst_17 = arith.constant -8.71484375 : f32
    %33 = vector.broadcast %cst_17 : f32 to vector<8x256xf32>
    %34 = arith.cmpf olt, %0, %33 : vector<8x256xf32>
    %cst_18 = arith.constant -0.08984375 : f32
    %35 = vector.broadcast %cst_18 : f32 to vector<8x256xf32>
    %36 = arith.select %34, %35, %30 : vector<8x256xi1>, vector<8x256xf32>
    %cst_19 = arith.constant -1.093750e+00 : f32
    %37 = vector.broadcast %cst_19 : f32 to vector<8x256xf32>
    %38 = arith.select %34, %37, %32 : vector<8x256xi1>, vector<8x256xf32>
    %cst_20 = arith.constant -1.200000e+01 : f32
    %39 = vector.broadcast %cst_20 : f32 to vector<8x256xf32>
    %40 = arith.cmpf olt, %0, %39 : vector<8x256xf32>
    %cst_21 = arith.constant -0.000000e+00 : f32
    %41 = vector.broadcast %cst_21 : f32 to vector<8x256xf32>
    %42 = arith.select %40, %41, %36 : vector<8x256xi1>, vector<8x256xf32>
    %cst_22 = arith.constant 0.000000e+00 : f32
    %43 = vector.broadcast %cst_22 : f32 to vector<8x256xf32>
    %44 = arith.select %40, %43, %38 : vector<8x256xi1>, vector<8x256xf32>
    %45 = arith.mulf %0, %42 : vector<8x256xf32>
    %46 = arith.addf %45, %44 : vector<8x256xf32>
    %c0_23 = arith.constant 0 : index
    %c0_24 = arith.constant 0 : index
    %47 = vector.load %arg2[%c0_23, %c0_24] : memref<8x256xf32, #tpu.memory_space<vmem>>, vector<8x256xf32>
    tpu.vector_store %arg2[%c0_23, %c0_24], %46 {strides = array<i32>} : memref<8x256xf32, #tpu.memory_space<vmem>>, vector<8x256xf32>,
    return
  }
  func.func @transform_0(%arg0: i32) -> (i32, i32) {
    %c0_i32 = arith.constant 0 : i32
    %c0_i32_0 = arith.constant 0 : i32
    return %arg0, %c0_i32 : i32, i32
  }
  func.func @transform_1(%arg0: i32) -> (i32, i32) {
    %c0_i32 = arith.constant 0 : i32
    %c0_i32_0 = arith.constant 0 : i32
    return %arg0, %c0_i32 : i32, i32
  }
}

</mosaic_0001>

<bundles_post_ra>
// kernel: hardpwl_hswish.1
= control target key start
LH: loop header
LB: loop body
LE: loop exit
PB: predicated region body
PF: predicated region fallthrough
CT: control target
= control target key end

     0   :  { %v64_v2 = vmov 0.25   ;;  %v65_v4 = vmov -0.0   ;;  %s94_s0 = inlined_call_operand.vmem [shape: f32[8,256], index: 0, kind: input, shape index: {}]   ;;  %s95_s1 = inlined_call_operand.vmem [shape: f32[8,256], index: 1, kind: output, shape index: {}]  }
   0x1   :  { %v8_v0 = vld [vmem:[%s94_s0] sm:$0xff]  ;;  %v9_v1 = vld [vmem:[%s94_s0 + $0x8] sm:$0xff] }
   0x2   :  { %vm10_vm0 = vcmp.lt.f32.partialorder %v8_v0, 11.953125  ;;  %vm16_vm1 = vcmp.lt.f32.partialorder %v8_v0, 7.3496094  ;;  %vm22_vm2 = vcmp.lt.f32.partialorder %v8_v0, 3.578125  ;;  %vm28_vm3 = vcmp.lt.f32.partialorder %v8_v0, -0.5234375 }
   0x3   :  { %v12_v3 = vsel %vm10_vm0, 0.32421875, %v64_v2  ;;  %v14_v5 = vsel %vm10_vm0, -0.921875, %v65_v4  ;;  %vm34_vm4 = vcmp.lt.f32.partialorder %v8_v0, -4.9140625  ;;  %vm40_vm5 = vcmp.lt.f32.partialorder %v8_v0, -8.714844 }
   0x4   :  { %v18_v6 = vsel %vm16_vm1, 0.23828125, %v12_v3  ;;  %v20_v7 = vsel %vm16_vm1, -0.28125, %v14_v5  ;;  %vm46_vm6 = vcmp.lt.f32.partialorder %v8_v0, -12.0  ;;  %vm11_vm7 = vcmp.lt.f32.partialorder %v9_v1, 11.953125 }
   0x5   :  { %v24_v8 = vsel %vm22_vm2, 0.15625, %v18_v6  ;;  %v26_v9 = vsel %vm22_vm2, 0.015625, %v20_v7  ;;  %v13_v10 = vsel %vm11_vm7, 0.32421875, %v64_v2  ;;  %v15_v11 = vsel %vm11_vm7, -0.921875, %v65_v4 }
   0x6   :  { %v30_v12 = vsel %vm28_vm3, 0.0703125, %v24_v8  ;;  %v32_v13 = vsel %vm28_vm3, -0.03125, %v26_v9  ;;  %vm17_vm8 = vcmp.lt.f32.partialorder %v9_v1, 7.3496094  ;;  %vm23_vm9 = vcmp.lt.f32.partialorder %v9_v1, 3.578125 }
   0x7   :  { %v36_v14 = vsel %vm34_vm4, -0.015625, %v30_v12  ;;  %v38_v15 = vsel %vm34_vm4, -0.453125, %v32_v13  ;;  %v19_v16 = vsel %vm17_vm8, 0.23828125, %v13_v10  ;;  %v21_v17 = vsel %vm17_vm8, -0.28125, %v15_v11 }
   0x8   :  { %v42_v18 = vsel %vm40_vm5, -0.08984375, %v36_v14  ;;  %v44_v19 = vsel %vm40_vm5, -1.09375, %v38_v15  ;;  %v25_v20 = vsel %vm23_vm9, 0.15625, %v19_v16  ;;  %v27_v21 = vsel %vm23_vm9, 0.015625, %v21_v17 }
   0x9   :  { %v48_v22 = vsel %vm46_vm6, -0.0, %v42_v18  ;;  %v50_v23 = vsel %vm46_vm6, 0.0, %v44_v19  ;;  %vm29_vm10 = vcmp.lt.f32.partialorder %v9_v1, -0.5234375  ;;  %vm35_vm11 = vcmp.lt.f32.partialorder %v9_v1, -4.9140625 }
   0xa   :  { %v52_v24 = vmul.f32 %v48_v22, %v8_v0  ;;  %v31_v25 = vsel %vm29_vm10, 0.0703125, %v25_v20  ;;  %v33_v26 = vsel %vm29_vm10, -0.03125, %v27_v21  ;;  %vm41_vm12 = vcmp.lt.f32.partialorder %v9_v1, -8.714844 }
   0xb   :  { %v37_v27 = vsel %vm35_vm11, -0.015625, %v31_v25  ;;  %v39_v28 = vsel %vm35_vm11, -0.453125, %v33_v26  ;;  %vm47_vm13 = vcmp.lt.f32.partialorder %v9_v1, -12.0 }
   0xc   :  { %v54_v29 = vadd.f32 %v52_v24, %v50_v23  ;;  %v43_v30 = vsel %vm41_vm12, -0.08984375, %v37_v27  ;;  %v45_v31 = vsel %vm41_vm12, -1.09375, %v39_v28 }
   0xd   :  { %v49_v32 = vsel %vm47_vm13, -0.0, %v43_v30  ;;  %v51_v33 = vsel %vm47_vm13, 0.0, %v45_v31 }
   0xe   :  { %56 = vst [vmem:[%s95_s1] sm:$0xff] %v54_v29  ;;  %v53_v34 = vmul.f32 %v49_v32, %v9_v1 }
  0x10   :  { %v55_v35 = vadd.f32 %v53_v34, %v51_v33 }
  0x12   :  { %57 = vst [vmem:[%s95_s1 + $0x8] sm:$0xff] %v55_v35 }

</bundles_post_ra>
